<compile_context>
chip_gen: v6e
topology: v6e:2x2x1
jax: 0.10.0
libtpu: 0.0.40
codegen_flags: <defaults>
</compile_context>

<pallas_src>
import functools

import jax
import jax.numpy as jnp
from jax.experimental import pallas as pl
from jax.experimental.pallas import tpu as pltpu


def _conv_lrelu_kernel(a_ref, w_ref, b_ref, o_ref, *, negative_slope):
    # a_ref: (K, TM) bf16 im2col tile (transposed), w_ref: (n_out_p, K) bf16,
    # b_ref: (n_out_p, 1) f32, o_ref: (n_out_p, TM) f32
    acc = jnp.dot(w_ref[...], a_ref[...], preferred_element_type=jnp.float32)
    acc = acc + b_ref[...]                                     # broadcast over the lane (M) axis
    o_ref[...] = jnp.where(acc >= 0.0, acc, negative_slope * acc).astype(o_ref.dtype)


def _pick_tm(M, K, n_out_p, tm_max=2048, vmem_budget=24 * 1024 * 1024):
    """Largest M tile (multiple of 128) that keeps >=2 grid steps (megacore) and fits VMEM."""
    m128 = -(-M // 128) * 128
    if m128 < 256:
        return 128
    tm = min(tm_max, max(128, (m128 // 2) // 128 * 128))
    while tm > 128:
        # double-buffered a-tile (bf16) + out-tile (f32); weight/bias are tiny & grid-invariant
        working = 2 * (K * tm * 2 + n_out_p * tm * 4)
        if working <= vmem_budget:
            break
        tm -= 128
    return tm


def leaky_relu_conv2d(x, weight, bias, *, stride, padding, negative_slope=0.01):
    """x: (N, C, H, W) float32; weight: (n_out, C, KH, KW); bias: (n_out,). Returns NCHW f32."""
    N, C, H, W = x.shape
    n_out, _, KH, KW = weight.shape

    # ReflectionPad2d(padding)  (requires padding < H and padding < W, same as PyTorch)
    if padding > 0:
        x = jnp.pad(x, ((0, 0), (0, 0), (padding, padding), (padding, padding)), mode="reflect")
    Hp, Wp = x.shape[2], x.shape[3]
    OH = (Hp - KH) // stride + 1
    OW = (Wp - KW) // stride + 1

    # im2col in transposed (K, M) layout: K ordered (C, KH, KW) to match weight.reshape(n_out,-1),
    # M ordered (N, OH, OW). Lane axis (last) is M -> dense loads in the kernel.
    taps = []
    for kh in range(KH):
        for kw in range(KW):
            taps.append(x[:, :, kh:kh + OH * stride:stride, kw:kw + OW * stride:stride])
    pat = jnp.stack(taps, axis=2)                  # (N, C, KH*KW, OH, OW)
    pat = pat.transpose(1, 2, 0, 3, 4)             # (C, KH*KW, N, OH, OW)
    K = C * KH * KW
    M = N * OH * OW
    a_t = pat.reshape(K, M).astype(jnp.bfloat16)   # (K, M), bf16 streamed operand

    # Weight / bias, with n_out padded up to a sublane multiple of 8.
    n_out_p = ((n_out + 7) // 8) * 8
    w_mat = weight.reshape(n_out, K).astype(jnp.bfloat16)      # (n_out, K)
    b_mat = bias.reshape(n_out, 1).astype(jnp.float32)         # (n_out, 1)
    if n_out_p != n_out:
        w_mat = jnp.pad(w_mat, ((0, n_out_p - n_out), (0, 0)))
        b_mat = jnp.pad(b_mat, ((0, n_out_p - n_out), (0, 0)))

    # Pick tile and pad M up to a multiple of it.
    tm = _pick_tm(M, K, n_out_p)
    M_pad = -(-M // tm) * tm
    if M_pad != M:
        a_t = jnp.pad(a_t, ((0, 0), (0, M_pad - M)))

    grid = (M_pad // tm,)
    out_t = pl.pallas_call(
        functools.partial(_conv_lrelu_kernel, negative_slope=negative_slope),
        out_shape=jax.ShapeDtypeStruct((n_out_p, M_pad), jnp.float32),
        grid_spec=pltpu.PrefetchScalarGridSpec(
            num_scalar_prefetch=0,
            grid=grid,
            in_specs=[
                pl.BlockSpec((K, tm), lambda i: (0, i)),        # A^T tile (lane-dense)
                pl.BlockSpec((n_out_p, K), lambda i: (0, 0)),   # full weight (grid-invariant)
                pl.BlockSpec((n_out_p, 1), lambda i: (0, 0)),   # bias column
            ],
            out_specs=pl.BlockSpec((n_out_p, tm), lambda i: (0, i)),  # lane-dense stores
        ),
        compiler_params=pltpu.CompilerParams(dimension_semantics=("parallel",)),
    )(a_t, w_mat, b_mat)

    # (n_out, M) -> NCHW.  TODO(synk): fuse this transpose into the consumer if it takes NHWC.
    out = out_t[:n_out, :M].reshape(n_out, N, OH, OW).transpose(1, 0, 2, 3)
    return out


def reference(x, weight, bias, *, stride, padding, negative_slope=0.01):
    if padding > 0:
        x = jnp.pad(x, ((0, 0), (0, 0), (padding, padding), (padding, padding)), mode="reflect")
    y = jax.lax.conv_general_dilated(
        x, weight, window_strides=(stride, stride), padding="VALID",
        dimension_numbers=("NCHW", "OIHW", "NCHW"))
    y = y + bias.reshape(1, -1, 1, 1)
    return jnp.where(y >= 0.0, y, negative_slope * y)


if __name__ == "__main__":
    key = jax.random.PRNGKey(0)
    k_x, k_w, k_b = jax.random.split(key, 3)

    N, n_in, H, W = 2, 4, 16, 16
    n_out, ksz, stride, padding = 8, 3, 1, 1

    x = jax.random.normal(k_x, (N, n_in, H, W), dtype=jnp.float32)
    # gaussian_weights_init: Conv weights ~ N(0, 0.02)
    weight = 0.02 * jax.random.normal(k_w, (n_out, n_in, ksz, ksz), dtype=jnp.float32)
    # bias: PyTorch default uniform in +/- 1/sqrt(fan_in)
    fan_in = n_in * ksz * ksz
    bound = 1.0 / (fan_in ** 0.5)
    bias = jax.random.uniform(k_b, (n_out,), dtype=jnp.float32, minval=-bound, maxval=bound)

    out = leaky_relu_conv2d(x, weight, bias, stride=stride, padding=padding)
    out = jax.block_until_ready(out)

    ref = reference(x, weight, bias, stride=stride, padding=padding)
    assert out.shape == (N, n_out, H, W), out.shape
    # bf16 MXU operands (f32 accumulate / bias / LeakyReLU) -> relaxed tolerance vs f32 reference.
    assert jnp.allclose(out, ref, atol=1e-2, rtol=1e-2), float(jnp.max(jnp.abs(out - ref)))

    print("KERNEL_OK")
</pallas_src>

<mosaic_0001>
module attributes {stable_mosaic.version = 11 : i64} {
  func.func @_conv_lrelu_kernel(%arg0: i32, %arg1: memref<36x256xbf16, #tpu.memory_space<vmem>>, %arg2: memref<8x36xbf16, #tpu.memory_space<vmem>>, %arg3: memref<8x1xf32, #tpu.memory_space<vmem>>, %arg4: memref<8x256xf32, #tpu.memory_space<vmem>>) attributes {dimension_semantics = [#tpu.dimension_semantics<parallel>], iteration_bounds = array<i64: 2>, scalar_prefetch = 0 : i64, scratch_operands = 0 : i64, tpu.core_type = #tpu.core_type<tc>, window_params = [{transform_indices = @transform_0, window_bounds = array<i64: 36, 256>}, {pipeline_mode = #tpu.pipeline_mode<synchronous>, transform_indices = @transform_1, window_bounds = array<i64: 8, 36>}, {pipeline_mode = #tpu.pipeline_mode<synchronous>, transform_indices = @transform_2, window_bounds = array<i64: 8, 1>}, {transform_indices = @transform_3, window_bounds = array<i64: 8, 256>}]} {
    %c0 = arith.constant 0 : index
    %c0_0 = arith.constant 0 : index
    %0 = vector.load %arg2[%c0, %c0_0] : memref<8x36xbf16, #tpu.memory_space<vmem>>, vector<8x36xbf16>
    %c0_1 = arith.constant 0 : index
    %c0_2 = arith.constant 0 : index
    %1 = vector.load %arg1[%c0_1, %c0_2] : memref<36x256xbf16, #tpu.memory_space<vmem>>, vector<36x256xbf16>
    %cst = arith.constant dense<0.000000e+00> : vector<8x256xf32>
    %2 = tpu.matmul %0, %1, %cst {dimension_numbers = #tpu.dot_dimension_numbers<[1], [0], [0], [1], [0, 0, 1, 1], [], []>} : vector<8x36xbf16>, vector<36x256xbf16>, vector<8x256xf32> -> vector<8x256xf32>
    %c0_3 = arith.constant 0 : index
    %c0_4 = arith.constant 0 : index
    %3 = vector.load %arg3[%c0_3, %c0_4] : memref<8x1xf32, #tpu.memory_space<vmem>>, vector<8x1xf32>
    %4 = vector.broadcast %3 : vector<8x1xf32> to vector<8x256xf32>
    %5 = arith.addf %2, %4 : vector<8x256xf32>
    %cst_5 = arith.constant 0.000000e+00 : f32
    %6 = vector.broadcast %cst_5 : f32 to vector<8x256xf32>
    %7 = arith.cmpf oge, %5, %6 : vector<8x256xf32>
    %cst_6 = arith.constant 0.00999999977 : f32
    %8 = vector.broadcast %cst_6 : f32 to vector<8x256xf32>
    %9 = arith.mulf %8, %5 : vector<8x256xf32>
    %10 = arith.select %7, %5, %9 : vector<8x256xi1>, vector<8x256xf32>
    %c0_7 = arith.constant 0 : index
    %c0_8 = arith.constant 0 : index
    %11 = vector.load %arg4[%c0_7, %c0_8] : memref<8x256xf32, #tpu.memory_space<vmem>>, vector<8x256xf32>
    tpu.vector_store %arg4[%c0_7, %c0_8], %10 {strides = array<i32>} : memref<8x256xf32, #tpu.memory_space<vmem>>, vector<8x256xf32>,
    return
  }
  func.func @transform_0(%arg0: i32) -> (i32, i32) {
    %c0_i32 = arith.constant 0 : i32
    %c0_i32_0 = arith.constant 0 : i32
    return %c0_i32, %arg0 : i32, i32
  }
  func.func @transform_1(%arg0: i32) -> (i32, i32) {
    %c0_i32 = arith.constant 0 : i32
    %c0_i32_0 = arith.constant 0 : i32
    %c0_i32_1 = arith.constant 0 : i32
    return %c0_i32, %c0_i32_0 : i32, i32
  }
  func.func @transform_2(%arg0: i32) -> (i32, i32) {
    %c0_i32 = arith.constant 0 : i32
    %c0_i32_0 = arith.constant 0 : i32
    %c0_i32_1 = arith.constant 0 : i32
    return %c0_i32, %c0_i32_0 : i32, i32
  }
  func.func @transform_3(%arg0: i32) -> (i32, i32) {
    %c0_i32 = arith.constant 0 : i32
    %c0_i32_0 = arith.constant 0 : i32
    return %c0_i32, %arg0 : i32, i32
  }
}

</mosaic_0001>

<bundles_post_ra>
// kernel: tpu_custom_call.1
= control target key start
LH: loop header
LB: loop body
LE: loop exit
PB: predicated region body
PF: predicated region fallthrough
CT: control target
= control target key end

     0   :  { %8 = vsyncpa [#allocation3], 0  ;;  %s726_s0 = inlined_call_operand.hbm [shape: bf16[36,512], index: 0, kind: input, shape index: {}]   ;;  %s727_s1 = inlined_call_operand.vmem [shape: bf16[8,36], index: 1, kind: input, shape index: {}]   ;;  %s728_s2 = inlined_call_operand.vmem [shape: f32[8,1], index: 2, kind: input, shape index: {}]   ;;  %s729_s3 = inlined_call_operand.hbm [shape: f32[8,512], index: 3, kind: output, shape index: {}]  }
   0x1   :  { %10 = vsyncpa [#allocation3 + $0x1], 0 }
   0x2   :  { %11 = vsyncpa [#allocation4], 0 }
   0x3   :  { %13 = vsyncpa [#allocation4 + $0x1], 0  ;;  %s577_s12 = smov 0   ;;  %s579_s13 = smov 0  }
   0x4   :  { %s581_s14 = smov 0   ;;  %s583_s15 = smov 0  }
   0x5 LB: > { %s598_s16 = sadd.s32 4294967295, %s549_s15   ;;  %s374_s17 = sadd.s32 4294967294, %s549_s15   ;;  %s549_s15 = sphi %s583_s15, %s744_s15   ;;  %s545_s14 = sphi %s581_s14, %s743_s14   ;;  %s541_s13 = sphi %s579_s13, %s742_s13   ;;  %s537_s12 = sphi %s577_s12, %s741_s12  }
   0x6   : > { %s602_s18 = sadd.s32 1, %s549_s15   ;;  %s26_s19 = sadd.s32 1, %s545_s14 }
   0x7   : > { %s23_s20 = ssub.s32 %s549_s15, %s602_s18  ;;  %p33_p0 = scmp.ne.s32.totalorder %s545_s14, %s541_s13 }
   0x8   : > { %p24_p1 = scmp.eq.s32.totalorder %s23_s20, 0  ;;  %p34_p2 = scmp.eq.s32.totalorder %s549_s15, 0 }
   0x9   : > { %p39_p3 = scmp.ne.s32.totalorder %s541_s13, %s537_s12  ;;  %p40_p4 = scmp.eq.s32.totalorder %s598_s16, 0 }
   0xa   : > { %s614_s21 = scalar_select %p24_p1, %s545_s14, %s26_s19  }
   0xb   : > { %p35_p5 = por %p34_p2, %p33_p0  ;;  %p616_p6 = por %p40_p4, %p39_p3 }
   0xc   : > { %p105_p7 = scmp.eq.s32.totalorder %s598_s16, 1  ;;  %p111_p8 = scmp.eq.s32.totalorder %s374_s17, 1 }
   0xd   : > { %s732_s22 = scalar_select %p616_p6, 1, 0 }
   0xe   : > { %p410_p10 = scmp.lt.s32.totalorder %s549_s15, 2  ;;  %p623_p11 = por %p105_p7, %p33_p0 }
   0xf   : > { %p627_p12 = por %p111_p8, %p39_p3  ;;  %s137_s25 = sand.u32 1, %s545_s14  }
  0x10   : > { %s733_s23 = scalar_select %p623_p11, 1, 0 }
  0x11   : > { %s734_s24 = scalar_select %p627_p12, 1, 0 }
  0x12   : > { %s394_s26 = sshll.u32 %s549_s15, 7  ;;  %s396_s27 = smul.u32 40, %s137_s25 }
  0x13   : > { %s636_s30 = scalar_lea.hbm %s726_s0, %s394_s26  ;;  %p638_p13 = pnand %p410_p10, %p35_p5 }
  0x14   : > { %s141_s5 = scalar_lea.vmem [#allocation2], %s396_s27  ;;  %s645_s7 = scalar_lea.sflag [#allocation3], %s137_s25 }
  0x15   : > { %s148_s6 = sshll.u32 %s141_s5, 4  ;;  %s457_s8 = scalar_lea.hbm %s636_s30, 640  ;;  %s642_s6 = int_to_ptr.vmem [resolvable:$true] %s148_s6 }
  0x16   : > { %p458_p1 = scmp.ne.s32.totalorder %s636_s30, %s457_s8  ;;  %p459_p2 = pneg %p638_p13 }
  0x17   : > { %s462_s11 = scalar_lea.hbm %s726_s0, 1280  ;;  %p463_p5 = scmp.lt.s32.totalorder %s636_s30, %s726_s0 }
  0x18   : > { %p460_p3 = pnand %p459_p2, %p458_p1  ;;  %p464_p7 = scmp.lt.s32.totalorder %s462_s11, %s457_s8 }
  0x1a   : > { %p461_p4 = pneg %p460_p3  ;;  %p465_p8 = por %p464_p7, %p463_p5 }
  0x1c   : > { %p466_p10 = pnand %p465_p8, %p461_p4 }
  0x1e   : > { %469 = shalt.err (!%p466_p10)
}
  0x1f   : > { %s470_s20 = scalar_lea.vmem %s642_s6, 640  ;;  %s551_s25 = smov [#allocation2]  }
  0x20   : > { %p471_p9 = scmp.ne.s32.totalorder %s642_s6, %s470_s20  ;;  %s475_s26 = sshll.u32 %s551_s25, 4  ;;  %s476_s26 = int_to_ptr.vmem [resolvable:$false] %s475_s26 }
  0x21   : > { %s477_s27 = scalar_lea.vmem %s476_s26, 1280  ;;  %p478_p3 = scmp.lt.s32.totalorder %s642_s6, %s476_s26 }
  0x22   : > { %p473_p0 = pnand %p471_p9, %p459_p2  ;;  %p479_p12 = scmp.lt.s32.totalorder %s477_s27, %s470_s20 }
  0x24   : > { %p474_p1 = pneg %p473_p0  ;;  %p480_p11 = por %p479_p12, %p478_p3 }
  0x26   : > { %p481_p6 = pnand %p480_p11, %p474_p1 }
  0x28   : > { %484 = shalt.err (!%p481_p6)
}
  0x29   : > { %s552_s28 = smov 256   ;;  %s553_s29 = smov 128  }
  0x2a   : > { %s554_s5 = smov 8   ;;  %p156_p9 = scmp.lt.s32.totalorder %s549_s15, 3 }
  0x2b   : > { %405 = dma.hbm_to_vmem [thread:$0]  (!%p638_p13), %s636_s30, 640, %s642_s6, %s645_s7, %s552_s28, %s553_s29, %s554_s5  }
  0x2c   : > { %p736_p0 = scmp.ge.s32.totalorder %s549_s15, 1 }
  0x2e   : > { %p157_p2 = pnand %p736_p0, %p156_p9 }
  0x2f   : > { %s670_s8 = sand.u32 (!%p157_p2), 1, %s541_s13   ;;  %p737_p6 = scmp.ne.s32.totalorder (!%p157_p2), %s732_s22, 0 }
  0x30   : > { %160 = sbr.rel (%p157_p2) target bundleno = 282 (0x11a), region = 32  ;;  %s163_s10 = scalar_lea.sflag (!%p157_p2), [#allocation3], %s670_s8 }
  0x31   : > { %s397_s9 = smul.u32 (!%p157_p2), 40, %s670_s8 }
  0x33   : > { %s166_s11 = scalar_lea.vmem (!%p157_p2), [#allocation2], %s397_s9 }
  0x35   : > { %528 = dma.done.wait (%p737_p6), %s163_s10, 640  }
  0x36   : > { %530 = vsyncadd (%p737_p6), %s163_s10, 4294966656  ;;  %v555_v0 = vmov 0   ;;  %v197_v1 = vld [vmem:[%s166_s11 + $0x20] sm:$0x33]  ;;  %vm233_vm0 = vcmask 1041408   ;;  %vm229_vm1 = vcmask 293888  }
  0x37   : > { %272 = vmatprep.mubr.bf16.mxu0 %v555_v0  ;;  %448 = vset.pattern.permute.xlu0 %v555_v0  ;;  %v386_v2 = vcombine.high %v197_v1, %v197_v1  ;;  %v385_v3 = vcombine.low %v197_v1, %v197_v1  ;;  %v451_v4 = vld [vmem:[%s166_s11 + $0x14] ss:$8 sps:$4 sm:$0xff]   ;;  %v453_v7 = vld [vmem:[%s166_s11 + $0x10] ss:$8 sps:$4 sm:$0xff]   ;;  %v454_v8 = vld [vmem:[%s166_s11 + $0x4] ss:$8 sps:$4 sm:$0xff]  }
  0x38   : > { %v198_v6 = vld [vmem:[%s728_s2] sm:$0xff]  ;;  %s380_s7 = sshll.u32 %s670_s8, 4  ;;  %s395_s17 = sshll.u32 %s598_s16, 8 }
  0x39   : > { %387 = vmatprep.subr.msk.bf16.mxu0 %vm233_vm0, %v386_v2  ;;  %v235_v5 = vsel %vm233_vm0, %v385_v3, 0  ;;  %201 = vperm.xlu0 %448, %v198_v6   ;;  %v456_v9 = vld [vmem:[%s166_s11] ss:$8 sps:$4 sm:$0xff]   ;;  %s188_s19 = scalar_lea.vmem [#allocation5], %s380_s7  ;;  %s689_s27 = scalar_lea.hbm %s729_s3, %s395_s17 }
  0x3a   : > { %251 = vmatpush1.bf16.msra.mxu0 %v235_v5  ;;  %v192_v10 = vld [vmem:[%s727_s1] sm:$0xf]  ;;  %s304_s20 = sshll.u32 %s188_s19, 4  ;;  %s290_s28 = scalar_lea.sflag [#allocation4], %s670_s8  ;;  %s305_s20 = int_to_ptr.vmem [resolvable:$true] %s304_s20 }
  0x3b   : > { %252 = vmatprep.subr.bf16.mxu0 %v451_v4  ;;  %s485_s29 = scalar_lea.vmem %s305_s20, 256  ;;  %p738_p12 = scmp.ne.s32.totalorder %s733_s23, 0 }
  0x3c   : > { %p486_p11 = scmp.ne.s32.totalorder %s305_s20, %s485_s29  ;;  %s556_s16 = smov [#allocation5]  }
  0x3d   : > { %s489_s5 = sshll.u32 %s556_s16, 4  ;;  %s490_s5 = int_to_ptr.vmem [resolvable:$false] %s489_s5 }
  0x3e   : > { %253 = vmatpush1.bf16.msra.mxu0 %v453_v7  ;;  %p487_p13 = pnand %p486_p11, %p738_p12  ;;  %s491_s9 = scalar_lea.vmem %s490_s5, 512 }
  0x3f   : > { %254 = vmatprep.subr.bf16.mxu0 %v454_v8  ;;  %p492_p5 = scmp.lt.s32.totalorder %s305_s20, %s490_s5  ;;  %p493_p7 = scmp.lt.s32.totalorder %s491_s9, %s485_s29 }
  0x40   : > { %p488_p4 = pneg %p487_p13 }
  0x41   : > { %p494_p8 = por %p493_p7, %p492_p5 }
  0x42   : > { %255 = vmatpush1.bf16.msra.mxu0 %v456_v9 }
  0x43   : > { %p495_p10 = pnand %p494_p8, %p488_p4 }
  0x45   : > { %388 = vmatmul.mubr.msk.bf16.vlgmr.msra.gmra.mxu0 %vm229_vm1, %v192_v10 }
  0xb4   : > { %v202_v11 = vpop.permute.xlu0 %201 }
 0x105   : > { %v274_v12 = vpop.f32.mrf.mxu0 }
 0x106   : > { %v275_v13 = vadd.f32 %v274_v12, %v202_v11 }
 0x107   : > { %v276_v14 = vpop.f32.mrf.mxu0 }
 0x108   : > { %vm281_vm2 = vcmp.ge.f32.partialorder %v275_v13, 0.0  ;;  %v283_v15 = vmul.f32 0.01, %v275_v13  ;;  %v277_v16 = vadd.f32 %v276_v14, %v202_v11 }
 0x109   : > { %v278_v17 = vpop.f32.mrf.mxu0 }
 0x10a   : > { %v285_v18 = vsel %vm281_vm2, %v275_v13, %v283_v15  ;;  %vm282_vm3 = vcmp.ge.f32.partialorder %v277_v16, 0.0  ;;  %v284_v19 = vmul.f32 0.01, %v277_v16 }
 0x10b   : > { %287 = vst [vmem:[%s188_s19] sm:$0xff] %v285_v18  ;;  %v279_v20 = vpop.f32.mrf.mxu0 }
 0x10c   : > { %v286_v21 = vsel %vm282_vm3, %v277_v16, %v284_v19 }
 0x10d   : > { %288 = vst [vmem:[%s188_s19 + $0x8] sm:$0xff] %v286_v21 }
 0x10e   : > { %498 = shalt.err (!%p495_p10)
}
 0x10f   : > { %s499_s10 = scalar_lea.hbm %s689_s27, 256  ;;  %s503_s30 = scalar_lea.hbm %s729_s3, 512 }
 0x110   : > { %p500_p1 = scmp.ne.s32.totalorder %s689_s27, %s499_s10  ;;  %p504_p0 = scmp.lt.s32.totalorder %s689_s27, %s729_s3 }
 0x111   : > { %p505_p2 = scmp.lt.s32.totalorder %s503_s30, %s499_s10 }
 0x112   : > { %p501_p3 = pnand %p500_p1, %p738_p12 }
 0x113   : > { %p506_p6 = por %p505_p2, %p504_p0 }
 0x114   : > { %p502_p9 = pneg %p501_p3 }
 0x116   : > { %p507_p11 = pnand %p506_p6, %p502_p9 }
 0x118   : > { %510 = shalt.err (!%p507_p11)
}
 0x119   : > { %400 = dma.vmem_to_hbm [thread:$0]  (%p738_p12), %s305_s20, 256, %s689_s27, %s290_s28  }
 0x11a PF: > { %s316_s6 = sand.u32 1, %s537_s12   ;;  %p739_p13 = scmp.ne.s32.totalorder %s734_s24, 0 }
 0x11b   : > { %p740_p4 = scmp.ge.s32.totalorder %s549_s15, 2  ;;  %s317_s7 = scalar_lea.sflag [#allocation4], %s316_s6 }
 0x11d   : > { %p407_p5 = pnand %p740_p4, %p739_p13 }
 0x11f   : > { %p408_p7 = pneg %p407_p5 }
 0x121   : > { %532 = dma.done.wait (%p408_p7), %s317_s7, 256  }
 0x122   : > { %534 = vsyncadd (%p408_p7), %s317_s7, 4294967040  ;;  %p16_p8 = scmp.ge.s32.totalorder %s602_s18, 4   ;;  %s741_s12 = smov %s541_s13 }
 0x123   : > { %s742_s13 = smov %s545_s14  ;;  %s743_s14 = smov %s614_s21 }
 0x124   : > { %s744_s15 = smov %s602_s18  ;;  %18 = sbr.rel (!%p16_p8) target bundleno = 5 (0x5), region = 77 }
 0x129   :  { %322 = vsyncpa [#allocation3], 1 }
 0x12a   :  { %324 = vsyncpa [#allocation3 + $0x1], 1 }
 0x12b   :  { %325 = vsyncpa [#allocation4], 1 }
 0x12c   :  { %327 = vsyncpa [#allocation4 + $0x1], 1 }

</bundles_post_ra>
